<compile_context>
chip_gen: v5e
topology: v5e:2x2
jax: 0.10.0
libtpu: 0.0.40
codegen_flags: <defaults>
</compile_context>

<pallas_src>
import functools

import jax
import jax.numpy as jnp
from jax.experimental import pallas as pl
from jax.experimental.pallas import tpu as pltpu

INPUT_SIZE = 16
OUTPUT_SIZE = 4
H1, H2, H3 = 256, 128, 64
NEG_SLOPE = 0.01  # PyTorch nn.LeakyReLU default

# ---- bf16 weight buffer layout: (W_ROWS, 128); every row offset % 16 == 0 ----
W1A_R0 = 0     # (16, 128)  Linear(16,256) output cols   0..127 (stored (in, out))
W1B_R0 = 16    # (16, 128)  Linear(16,256) output cols 128..255
W2A_R0 = 32    # (128,128)  Linear(256,128) input rows    0..127
W2B_R0 = 160   # (128,128)  Linear(256,128) input rows  128..255
WH1_R0 = 288   # (128,128)  fused head layer 1 = [wv1 | wa1]
WH2_R0 = 416   # (128,128)  fused head layer 2: cols 0..3 -> V + A_j, cols 4..7 -> A_j
W_ROWS = 544
W_COLS = 128

# ---- f32 bias buffer layout: (8, 256) ----
B1_R = 0       # cols 0..255 : feature Linear(16,256) bias
B2_R = 1       # cols 0..127 : feature Linear(256,128) bias
BH1_R = 2      # cols 0..127 : [bv1 | ba1]
BH2_R = 3      # cols 0..7   : [bv2 + ba2_j (j=0..3), ba2_j (j=0..3)], rest 0
B_ROWS = 8
B_COLS = 256


def _round_up(x, m):
    return ((x + m - 1) // m) * m


def _leaky_relu(x):
    # max(x, a*x) == where(x >= 0, x, a*x) for 0 < a < 1; one vmul + vmax (f32).
    return jnp.maximum(x, NEG_SLOPE * x)


def dueling_dqn_kernel(x_ref, w_ref, b_ref, q_ref, asum_ref, *,
                       valid_rows, fuse_combine):
    f32, bf16 = jnp.float32, jnp.bfloat16
    x = x_ref[...].astype(bf16)                               # (tb, 16)

    # Feature layer 1: Linear(16,256) + LeakyReLU, as two 128-lane output bands.
    w1a = w_ref[W1A_R0:W1A_R0 + INPUT_SIZE, :]                # (16, 128) bf16
    w1b = w_ref[W1B_R0:W1B_R0 + INPUT_SIZE, :]
    b1a = b_ref[B1_R:B1_R + 1, 0:H2]                          # (1, 128) f32
    b1b = b_ref[B1_R:B1_R + 1, H2:H1]
    h1a = _leaky_relu(jnp.dot(x, w1a, preferred_element_type=f32) + b1a).astype(bf16)
    h1b = _leaky_relu(jnp.dot(x, w1b, preferred_element_type=f32) + b1b).astype(bf16)

    # Feature layer 2: Linear(256,128) + LeakyReLU (contraction split into two dots).
    w2a = w_ref[W2A_R0:W2A_R0 + H2, :]                        # (128, 128)
    w2b = w_ref[W2B_R0:W2B_R0 + H2, :]
    b2 = b_ref[B2_R:B2_R + 1, 0:H2]
    feats = _leaky_relu(
        jnp.dot(h1a, w2a, preferred_element_type=f32)
        + jnp.dot(h1b, w2b, preferred_element_type=f32) + b2).astype(bf16)

    # Fused value+advantage head layer 1: one full-lane (tb,128)x(128,128) matmul.
    wh1 = w_ref[WH1_R0:WH1_R0 + H2, :]
    bh1 = b_ref[BH1_R:BH1_R + 1, 0:H2]
    hid = _leaky_relu(jnp.dot(feats, wh1, preferred_element_type=f32) + bh1).astype(bf16)

    # Fused head layer 2: lanes 0..3 = V + A_j, lanes 4..7 = A_j, remaining lanes ~0.
    wh2 = w_ref[WH2_R0:WH2_R0 + H2, :]
    bh2 = b_ref[BH2_R:BH2_R + 1, 0:H2]
    va = jnp.dot(hid, wh2, preferred_element_type=f32) + bh2   # (tb, 128) f32

    # Per-tile sum of advantages over VALID batch rows only (padded rows masked).
    tb = va.shape[0]
    row = pl.program_id(0) * tb + jax.lax.broadcasted_iota(jnp.int32, (tb, W_COLS), 0)
    lane = jax.lax.broadcasted_iota(jnp.int32, (tb, W_COLS), 1)
    sel = (row < valid_rows) & (lane >= OUTPUT_SIZE) & (lane < 2 * OUTPUT_SIZE)
    tile_a_sum = jnp.sum(jnp.where(sel, va, 0.0))
    asum_ref[...] = jnp.broadcast_to(tile_a_sum, asum_ref.shape)

    if fuse_combine:
        # Whole batch in this single tile: finish q = V + A - mean(A) in-kernel.
        mean_a = tile_a_sum * (1.0 / float(valid_rows * OUTPUT_SIZE))
        q_ref[...] = va - mean_a
    else:
        q_ref[...] = va


def pack_params(p):
    """Pack the 13 PyTorch-style params into (bf16 weight buffer, f32 bias buffer)."""
    w = jnp.zeros((W_ROWS, W_COLS), jnp.float32)
    w = w.at[W1A_R0:W1A_R0 + INPUT_SIZE, :].set(p["w1"][:, 0:H2])
    w = w.at[W1B_R0:W1B_R0 + INPUT_SIZE, :].set(p["w1"][:, H2:H1])
    w = w.at[W2A_R0:W2A_R0 + H2, :].set(p["w2"][0:H2, :])
    w = w.at[W2B_R0:W2B_R0 + H2, :].set(p["w2"][H2:H1, :])
    w = w.at[WH1_R0:WH1_R0 + H2, :].set(jnp.concatenate([p["wv1"], p["wa1"]], axis=1))

    wh2 = jnp.zeros((H2, W_COLS), jnp.float32)
    # Columns 0..3: top half = value weights, bottom half = advantage weights,
    # so matmul output lane j is V + A_j directly (bias = bv2 + ba2_j).
    wh2 = wh2.at[0:H3, 0:OUTPUT_SIZE].set(jnp.broadcast_to(p["wv2"], (H3, OUTPUT_SIZE)))
    wh2 = wh2.at[H3:H2, 0:OUTPUT_SIZE].set(p["wa2"])
    # Columns 4..7: advantage only (used for the global mean(A)).
    wh2 = wh2.at[H3:H2, OUTPUT_SIZE:2 * OUTPUT_SIZE].set(p["wa2"])
    w = w.at[WH2_R0:WH2_R0 + H2, :].set(wh2)

    b = jnp.zeros((B_ROWS, B_COLS), jnp.float32)
    b = b.at[B1_R, 0:H1].set(p["b1"][0])
    b = b.at[B2_R, 0:H2].set(p["b2"][0])
    b = b.at[BH1_R, 0:H2].set(jnp.concatenate([p["bv1"], p["ba1"]], axis=1)[0])
    bh2 = jnp.zeros((H2,), jnp.float32)
    bh2 = bh2.at[0:OUTPUT_SIZE].set(p["bv2"][0, 0] + p["ba2"][0])
    bh2 = bh2.at[OUTPUT_SIZE:2 * OUTPUT_SIZE].set(p["ba2"][0])
    b = b.at[BH2_R, 0:H2].set(bh2)
    return w.astype(jnp.bfloat16), b


def dueling_dqn_forward(state, packed_weights, packed_biases, *, tile_b=1024):
    """state: (B, 16) f32. packed_weights: (544, 128) bf16. packed_biases: (8, 256) f32."""
    B = state.shape[0]
    b_req = _round_up(B, 8)
    if b_req <= tile_b:
        if b_req >= 1024:
            # Big single-tile batch: split in two so both v7x TensorCores get work.
            tb = _round_up((b_req + 1) // 2, 8)
        else:
            tb = b_req
    else:
        tb = tile_b
    nb = -(-B // tb)
    b_pad = nb * tb
    if b_pad != B:
        state = jnp.pad(state, ((0, b_pad - B), (0, 0)))
    fuse_combine = (nb == 1)

    kernel = functools.partial(dueling_dqn_kernel, valid_rows=B,
                               fuse_combine=fuse_combine)
    q_slab, a_partials = pl.pallas_call(
        kernel,
        out_shape=(
            jax.ShapeDtypeStruct((b_pad, W_COLS), jnp.float32),   # lane-dense Q slab
            jax.ShapeDtypeStruct((nb, 8, W_COLS), jnp.float32),   # per-tile masked sum(A)
        ),
        grid=(nb,),
        in_specs=[
            pl.BlockSpec((tb, INPUT_SIZE), lambda i: (i, 0)),     # batch-tiled input
            # Packed params: constant index_map -> single HBM->VMEM DMA, the block
            # stays VMEM-resident across all grid steps.
            pl.BlockSpec((W_ROWS, W_COLS), lambda i: (0, 0)),
            pl.BlockSpec((B_ROWS, B_COLS), lambda i: (0, 0)),
        ],
        out_specs=(
            pl.BlockSpec((tb, W_COLS), lambda i: (i, 0)),
            pl.BlockSpec((1, 8, W_COLS), lambda i: (i, 0, 0)),
        ),
        compiler_params=pltpu.CompilerParams(
            dimension_semantics=("parallel",)),                   # megacore on v7x
    )(state, packed_weights, packed_biases)

    q = q_slab[:B, 0:OUTPUT_SIZE]
    if not fuse_combine:
        # Cross-tile GLOBAL mean over batch AND actions (PyTorch `.mean()` semantics):
        # per-tile sums already exclude padded rows, so this is exact.
        mean_a = jnp.sum(a_partials[:, 0, 0]) / float(B * OUTPUT_SIZE)
        q = q - mean_a
    return q


def init_params(key):
    """Deterministic synthetic parameter init (Kaiming-ish uniform like PyTorch)."""
    def linear(key, fan_in, fan_out):
        kw, kb = jax.random.split(key)
        bound = 1.0 / jnp.sqrt(fan_in)
        # stored as (in, out): equivalent to PyTorch weight.T
        w = jax.random.uniform(kw, (fan_in, fan_out), jnp.float32, -bound, bound)
        b = jax.random.uniform(kb, (1, fan_out), jnp.float32, -bound, bound)
        return w, b

    keys = jax.random.split(key, 6)
    w1, b1 = linear(keys[0], INPUT_SIZE, H1)
    w2, b2 = linear(keys[1], H1, H2)
    wv1, bv1 = linear(keys[2], H2, H3)
    wv2, bv2 = linear(keys[3], H3, 1)
    wa1, ba1 = linear(keys[4], H2, H3)
    wa2, ba2 = linear(keys[5], H3, OUTPUT_SIZE)
    return dict(
        w1=w1, b1=b1, w2=w2, b2=b2,
        wv1=wv1, bv1=bv1, wv2=wv2, bv2=bv2,
        wa1=wa1, ba1=ba1, wa2=wa2, ba2=ba2,
    )


def dueling_dqn_ref(state, p):
    """Pure-JAX f32 reference mirroring the PyTorch forward (unfused, unpacked)."""
    def lrelu(x):
        return jnp.where(x >= 0, x, NEG_SLOPE * x)
    h = lrelu(state @ p["w1"] + p["b1"])
    feats = lrelu(h @ p["w2"] + p["b2"])
    v = lrelu(feats @ p["wv1"] + p["bv1"]) @ p["wv2"] + p["bv2"]
    a = lrelu(feats @ p["wa1"] + p["ba1"]) @ p["wa2"] + p["ba2"]
    return v + (a - jnp.mean(a))


if __name__ == "__main__":
    key = jax.random.PRNGKey(0)
    k_params, k_state1, k_state2 = jax.random.split(key, 3)

    params = init_params(k_params)
    w_packed, b_packed = pack_params(params)

    fwd = jax.jit(dueling_dqn_forward, static_argnames=("tile_b",))

    # Case 1: whole batch in one tile -> dueling combine fused entirely in-kernel.
    batch = 8
    state = jax.random.normal(k_state1, (batch, INPUT_SIZE), dtype=jnp.float32)
    q = jax.block_until_ready(fwd(state, w_packed, b_packed))
    q_ref = dueling_dqn_ref(state, params)
    assert q.shape == (batch, OUTPUT_SIZE)
    # bf16 MXU operands (f32 accumulation) -> looser tolerance vs f32 reference.
    assert jnp.allclose(q, q_ref, atol=5e-2, rtol=5e-2), "mismatch (single tile)"

    # Case 2: multi-tile batch with ragged padding -> per-tile masked partial sums
    # plus the tiny exact XLA epilogue for the global mean.
    batch2 = 20
    state2 = jax.random.normal(k_state2, (batch2, INPUT_SIZE), dtype=jnp.float32)
    q2 = jax.block_until_ready(fwd(state2, w_packed, b_packed, tile_b=8))
    q2_ref = dueling_dqn_ref(state2, params)
    assert q2.shape == (batch2, OUTPUT_SIZE)
    assert jnp.allclose(q2, q2_ref, atol=5e-2, rtol=5e-2), "mismatch (multi tile)"

    print("KERNEL_OK")
</pallas_src>

<mosaic_0001>
module attributes {stable_mosaic.version = 11 : i64} {
  func.func @dueling_dqn_kernel(%arg0: i32, %arg1: memref<8x16xf32, #tpu.memory_space<vmem>>, %arg2: memref<544x128xbf16, #tpu.memory_space<vmem>>, %arg3: memref<8x256xf32, #tpu.memory_space<vmem>>, %arg4: memref<8x128xf32, #tpu.memory_space<vmem>>, %arg5: memref<1x8x128xf32, #tpu.memory_space<vmem>>) attributes {dimension_semantics = [#tpu.dimension_semantics<parallel>], iteration_bounds = array<i64: 1>, scalar_prefetch = 0 : i64, scratch_operands = 0 : i64, tpu.core_type = #tpu.core_type<tc>, window_params = [{transform_indices = @transform_0, window_bounds = array<i64: 8, 16>}, {pipeline_mode = #tpu.pipeline_mode<synchronous>, transform_indices = @transform_1, window_bounds = array<i64: 544, 128>}, {pipeline_mode = #tpu.pipeline_mode<synchronous>, transform_indices = @transform_2, window_bounds = array<i64: 8, 256>}, {transform_indices = @transform_3, window_bounds = array<i64: 8, 128>}, {transform_indices = @transform_4, window_bounds = array<i64: 1, 8, 128>}]} {
    %c0 = arith.constant 0 : index
    %c0_0 = arith.constant 0 : index
    %0 = vector.load %arg1[%c0, %c0_0] : memref<8x16xf32, #tpu.memory_space<vmem>>, vector<8x16xf32>
    %1 = arith.truncf %0 : vector<8x16xf32> to vector<8x16xbf16>
    %c0_1 = arith.constant 0 : index
    %c0_2 = arith.constant 0 : index
    %2 = vector.load %arg2[%c0_1, %c0_2] : memref<544x128xbf16, #tpu.memory_space<vmem>>, vector<16x128xbf16>
    %c16 = arith.constant 16 : index
    %c0_3 = arith.constant 0 : index
    %3 = vector.load %arg2[%c16, %c0_3] : memref<544x128xbf16, #tpu.memory_space<vmem>>, vector<16x128xbf16>
    %c0_4 = arith.constant 0 : index
    %c0_5 = arith.constant 0 : index
    %4 = vector.load %arg3[%c0_4, %c0_5] : memref<8x256xf32, #tpu.memory_space<vmem>>, vector<1x128xf32>
    %c0_6 = arith.constant 0 : index
    %c128 = arith.constant 128 : index
    %5 = vector.load %arg3[%c0_6, %c128] : memref<8x256xf32, #tpu.memory_space<vmem>>, vector<1x128xf32>
    %cst = arith.constant dense<0.000000e+00> : vector<8x128xf32>
    %6 = tpu.matmul %1, %2, %cst {dimension_numbers = #tpu.dot_dimension_numbers<[1], [0], [0], [1], [0, 0, 1, 1], [], []>} : vector<8x16xbf16>, vector<16x128xbf16>, vector<8x128xf32> -> vector<8x128xf32>
    %7 = vector.broadcast %4 : vector<1x128xf32> to vector<8x128xf32>
    %8 = arith.addf %6, %7 : vector<8x128xf32>
    %cst_7 = arith.constant 0.00999999977 : f32
    %9 = vector.broadcast %cst_7 : f32 to vector<8x128xf32>
    %10 = arith.mulf %9, %8 : vector<8x128xf32>
    %11 = arith.maximumf %8, %10 : vector<8x128xf32>
    %12 = arith.truncf %11 : vector<8x128xf32> to vector<8x128xbf16>
    %cst_8 = arith.constant dense<0.000000e+00> : vector<8x128xf32>
    %13 = tpu.matmul %1, %3, %cst_8 {dimension_numbers = #tpu.dot_dimension_numbers<[1], [0], [0], [1], [0, 0, 1, 1], [], []>} : vector<8x16xbf16>, vector<16x128xbf16>, vector<8x128xf32> -> vector<8x128xf32>
    %14 = vector.broadcast %5 : vector<1x128xf32> to vector<8x128xf32>
    %15 = arith.addf %13, %14 : vector<8x128xf32>
    %cst_9 = arith.constant 0.00999999977 : f32
    %16 = vector.broadcast %cst_9 : f32 to vector<8x128xf32>
    %17 = arith.mulf %16, %15 : vector<8x128xf32>
    %18 = arith.maximumf %15, %17 : vector<8x128xf32>
    %19 = arith.truncf %18 : vector<8x128xf32> to vector<8x128xbf16>
    %c32 = arith.constant 32 : index
    %c0_10 = arith.constant 0 : index
    %20 = vector.load %arg2[%c32, %c0_10] : memref<544x128xbf16, #tpu.memory_space<vmem>>, vector<128x128xbf16>
    %c160 = arith.constant 160 : index
    %c0_11 = arith.constant 0 : index
    %21 = vector.load %arg2[%c160, %c0_11] : memref<544x128xbf16, #tpu.memory_space<vmem>>, vector<128x128xbf16>
    %c1 = arith.constant 1 : index
    %c0_12 = arith.constant 0 : index
    %22 = vector.load %arg3[%c1, %c0_12] : memref<8x256xf32, #tpu.memory_space<vmem>>, vector<1x128xf32>
    %cst_13 = arith.constant dense<0.000000e+00> : vector<8x128xf32>
    %23 = tpu.matmul %12, %20, %cst_13 {dimension_numbers = #tpu.dot_dimension_numbers<[1], [0], [0], [1], [0, 0, 1, 1], [], []>} : vector<8x128xbf16>, vector<128x128xbf16>, vector<8x128xf32> -> vector<8x128xf32>
    %cst_14 = arith.constant dense<0.000000e+00> : vector<8x128xf32>
    %24 = tpu.matmul %19, %21, %cst_14 {dimension_numbers = #tpu.dot_dimension_numbers<[1], [0], [0], [1], [0, 0, 1, 1], [], []>} : vector<8x128xbf16>, vector<128x128xbf16>, vector<8x128xf32> -> vector<8x128xf32>
    %25 = arith.addf %23, %24 : vector<8x128xf32>
    %26 = vector.broadcast %22 : vector<1x128xf32> to vector<8x128xf32>
    %27 = arith.addf %25, %26 : vector<8x128xf32>
    %cst_15 = arith.constant 0.00999999977 : f32
    %28 = vector.broadcast %cst_15 : f32 to vector<8x128xf32>
    %29 = arith.mulf %28, %27 : vector<8x128xf32>
    %30 = arith.maximumf %27, %29 : vector<8x128xf32>
    %31 = arith.truncf %30 : vector<8x128xf32> to vector<8x128xbf16>
    %c288 = arith.constant 288 : index
    %c0_16 = arith.constant 0 : index
    %32 = vector.load %arg2[%c288, %c0_16] : memref<544x128xbf16, #tpu.memory_space<vmem>>, vector<128x128xbf16>
    %c2 = arith.constant 2 : index
    %c0_17 = arith.constant 0 : index
    %33 = vector.load %arg3[%c2, %c0_17] : memref<8x256xf32, #tpu.memory_space<vmem>>, vector<1x128xf32>
    %cst_18 = arith.constant dense<0.000000e+00> : vector<8x128xf32>
    %34 = tpu.matmul %31, %32, %cst_18 {dimension_numbers = #tpu.dot_dimension_numbers<[1], [0], [0], [1], [0, 0, 1, 1], [], []>} : vector<8x128xbf16>, vector<128x128xbf16>, vector<8x128xf32> -> vector<8x128xf32>
    %35 = vector.broadcast %33 : vector<1x128xf32> to vector<8x128xf32>
    %36 = arith.addf %34, %35 : vector<8x128xf32>
    %cst_19 = arith.constant 0.00999999977 : f32
    %37 = vector.broadcast %cst_19 : f32 to vector<8x128xf32>
    %38 = arith.mulf %37, %36 : vector<8x128xf32>
    %39 = arith.maximumf %36, %38 : vector<8x128xf32>
    %40 = arith.truncf %39 : vector<8x128xf32> to vector<8x128xbf16>
    %c416 = arith.constant 416 : index
    %c0_20 = arith.constant 0 : index
    %41 = vector.load %arg2[%c416, %c0_20] : memref<544x128xbf16, #tpu.memory_space<vmem>>, vector<128x128xbf16>
    %c3 = arith.constant 3 : index
    %c0_21 = arith.constant 0 : index
    %42 = vector.load %arg3[%c3, %c0_21] : memref<8x256xf32, #tpu.memory_space<vmem>>, vector<1x128xf32>
    %cst_22 = arith.constant dense<0.000000e+00> : vector<8x128xf32>
    %43 = tpu.matmul %40, %41, %cst_22 {dimension_numbers = #tpu.dot_dimension_numbers<[1], [0], [0], [1], [0, 0, 1, 1], [], []>} : vector<8x128xbf16>, vector<128x128xbf16>, vector<8x128xf32> -> vector<8x128xf32>
    %44 = vector.broadcast %42 : vector<1x128xf32> to vector<8x128xf32>
    %45 = arith.addf %43, %44 : vector<8x128xf32>
    %c8_i32 = arith.constant 8 : i32
    %46 = arith.muli %arg0, %c8_i32 : i32
    %47 = tpu.iota {dimensions = array<i32: 0>} : vector<8x128xi32>
    %48 = vector.broadcast %46 : i32 to vector<8x128xi32>
    %49 = arith.addi %48, %47 : vector<8x128xi32>
    %50 = tpu.iota {dimensions = array<i32: 1>} : vector<8x128xi32>
    %c8_i32_23 = arith.constant 8 : i32
    %51 = vector.broadcast %c8_i32_23 : i32 to vector<8x128xi32>
    %52 = arith.cmpi slt, %49, %51 : vector<8x128xi32>
    %c4_i32 = arith.constant 4 : i32
    %53 = vector.broadcast %c4_i32 : i32 to vector<8x128xi32>
    %54 = arith.cmpi sge, %50, %53 : vector<8x128xi32>
    %55 = arith.andi %52, %54 : vector<8x128xi1>
    %c8_i32_24 = arith.constant 8 : i32
    %56 = vector.broadcast %c8_i32_24 : i32 to vector<8x128xi32>
    %57 = arith.cmpi slt, %50, %56 : vector<8x128xi32>
    %58 = arith.andi %55, %57 : vector<8x128xi1>
    %cst_25 = arith.constant 0.000000e+00 : f32
    %59 = vector.broadcast %cst_25 : f32 to vector<8x128xf32>
    %60 = arith.select %58, %45, %59 : vector<8x128xi1>, vector<8x128xf32>
    %61 = vector.shape_cast %60 : vector<8x128xf32> to vector<1x8x128xf32>
    %cst_26 = arith.constant dense<0.000000e+00> : vector<1xf32>
    %62 = vector.multi_reduction <add>, %61, %cst_26 [1, 2] : vector<1x8x128xf32> to vector<1xf32>
    %63 = vector.shape_cast %62 : vector<1xf32> to vector<1x1x1xf32>
    %64 = vector.extract %63[0, 0, 0] : f32 from vector<1x1x1xf32>
    %65 = vector.broadcast %64 : f32 to vector<1x8x128xf32>
    %c0_27 = arith.constant 0 : index
    %c0_28 = arith.constant 0 : index
    %c0_29 = arith.constant 0 : index
    %66 = vector.load %arg5[%c0_27, %c0_28, %c0_29] : memref<1x8x128xf32, #tpu.memory_space<vmem>>, vector<1x8x128xf32>
    tpu.vector_store %arg5[%c0_27, %c0_28, %c0_29], %65 {strides = array<i32>} : memref<1x8x128xf32, #tpu.memory_space<vmem>>, vector<1x8x128xf32>,
    %cst_30 = arith.constant 3.125000e-02 : f32
    %67 = arith.mulf %64, %cst_30 : f32
    %68 = vector.broadcast %67 : f32 to vector<8x128xf32>
    %69 = arith.subf %45, %68 : vector<8x128xf32>
    %c0_31 = arith.constant 0 : index
    %c0_32 = arith.constant 0 : index
    %70 = vector.load %arg4[%c0_31, %c0_32] : memref<8x128xf32, #tpu.memory_space<vmem>>, vector<8x128xf32>
    tpu.vector_store %arg4[%c0_31, %c0_32], %69 {strides = array<i32>} : memref<8x128xf32, #tpu.memory_space<vmem>>, vector<8x128xf32>,
    return
  }
  func.func @transform_0(%arg0: i32) -> (i32, i32) {
    %c0_i32 = arith.constant 0 : i32
    %c0_i32_0 = arith.constant 0 : i32
    return %arg0, %c0_i32 : i32, i32
  }
  func.func @transform_1(%arg0: i32) -> (i32, i32) {
    %c0_i32 = arith.constant 0 : i32
    %c0_i32_0 = arith.constant 0 : i32
    %c0_i32_1 = arith.constant 0 : i32
    return %c0_i32, %c0_i32_0 : i32, i32
  }
  func.func @transform_2(%arg0: i32) -> (i32, i32) {
    %c0_i32 = arith.constant 0 : i32
    %c0_i32_0 = arith.constant 0 : i32
    %c0_i32_1 = arith.constant 0 : i32
    return %c0_i32, %c0_i32_0 : i32, i32
  }
  func.func @transform_3(%arg0: i32) -> (i32, i32) {
    %c0_i32 = arith.constant 0 : i32
    %c0_i32_0 = arith.constant 0 : i32
    return %arg0, %c0_i32 : i32, i32
  }
  func.func @transform_4(%arg0: i32) -> (i32, i32, i32) {
    %c0_i32 = arith.constant 0 : i32
    %c0_i32_0 = arith.constant 0 : i32
    %c0_i32_1 = arith.constant 0 : i32
    return %arg0, %c0_i32, %c0_i32_0 : i32, i32, i32
  }
}

</mosaic_0001>

<bundles_post_ra>
// kernel: dueling_dqn_forward.1
= control target key start
LH: loop header
LB: loop body
LE: loop exit
PB: predicated region body
PF: predicated region fallthrough
CT: control target
= control target key end

     0   :  { %10 = vsyncpa [#allocation3], 0  ;;  %s813_s0 = inlined_call_operand.hbm [shape: f32[8,16], index: 0, kind: input, shape index: {}]   ;;  %s814_s1 = inlined_call_operand.hbm [shape: bf16[544,128], index: 1, kind: input, shape index: {}]   ;;  %s815_s2 = inlined_call_operand.hbm [shape: f32[8,256], index: 2, kind: input, shape index: {}]   ;;  %s816_s3 = inlined_call_operand.vmem [shape: f32[8,128], index: 3, kind: output, shape index: {0}]   ;;  %s817_s4 = inlined_call_operand.hbm [shape: f32[1,8,128], index: 4, kind: output, shape index: {1}]  }
   0x1   :  { %11 = vsyncpa [#allocation6], 0  ;;  %s28_s17 = sshll.u32 %s814_s1, 4  ;;  %s29_s17 = int_to_ptr.hbm [resolvable:$true] %s28_s17 }
   0x2   :  { %12 = vsyncpa [#allocation4], 0  ;;  %s767_s18 = smov [#allocation5]   ;;  %s18_s22 = sshll.u32 %s813_s0, 4  ;;  %s19_s22 = int_to_ptr.hbm [resolvable:$true] %s18_s22 }
   0x3   :  { %s30_s19 = sshll.u32 %s767_s18, 4  ;;  %s768_s23 = smov 64   ;;  %s31_s19 = int_to_ptr.vmem [resolvable:$true] %s30_s19 }
   0x4   :  { %s769_s24 = smov 4   ;;  %s770_s25 = smov [#allocation2]  }
   0x5   :  { %36 = dma.hbm_to_vmem [thread:$0]  %s29_s17, 4352, %s31_s19, [#allocation6], %s768_s23, %s768_s23, %s769_s24  }
   0x6   :  { %s20_s26 = sshll.u32 %s770_s25, 4  ;;  %s42_s29 = sshll.u32 %s815_s2, 4  ;;  %s21_s26 = int_to_ptr.vmem [resolvable:$true] %s20_s26  ;;  %s43_s29 = int_to_ptr.hbm [resolvable:$true] %s42_s29 }
   0x7   :  { %23 = dma.hbm_to_vmem [thread:$0]  %s19_s22, 128, %s21_s26, [#allocation3]  }
   0x8   :  { %s771_s1 = smov [#allocation7]  }
   0x9   :  { %s44_s30 = sshll.u32 %s771_s1, 4  ;;  %s45_s30 = int_to_ptr.vmem [resolvable:$true] %s44_s30 }
   0xa   :  { %47 = dma.hbm_to_vmem [thread:$0]  %s43_s29, 256, %s45_s30, [#allocation6]  }
   0xb   :  { %761 = dma.done.wait [#allocation3], 128  }
   0xc   :  { %762 = vsyncadd [#allocation3], 4294967168 }
   0xd   :  { %763 = dma.done.wait [#allocation6], 4608  }
   0xe   :  { %764 = vsyncadd [#allocation6], 4294962688  ;;  %v623_v0 = vld [vmem:[#allocation5] sm:$0xff]  ;;  %v624_v1 = vld [vmem:[#allocation5 + $0x8] sm:$0xff]  ;;  %vm75_vm0 = vcmask 130048   ;;  %s772_s0 = smov [#allocation8]  }
   0xf   :  { %v61_v2 = vld [vmem:[#allocation2] sm:$0xff]  ;;  %v640_v4 = vld [vmem:[#allocation5 + $0x88] sm:$0xff]  ;;  %86 = vmatpush.bf16.msra.mxu0 %v623_v0  ;;  %108 = vmatpush.bf16.msra.mxu1 %v624_v1  ;;  %v639_v6 = vld [vmem:[#allocation5 + $0x80] sm:$0xff]  ;;  %s470_s2 = sshll.u32 %s772_s0, 4  ;;  %s472_s7 = sshll.u32 %s817_s4, 4  ;;  %s471_s2 = int_to_ptr.vmem [resolvable:$true] %s470_s2  ;;  %s473_s7 = int_to_ptr.hbm [resolvable:$true] %s472_s7 }
  0x10   :  { %v62_v3 = vpack.c.bf16 %v61_v2, %v61_v2  ;;  %v632_v5 = vld [vmem:[#allocation5 + $0x48] sm:$0xff]  ;;  %198 = vmatpush.bf16.msra.mxu2 %v640_v4  ;;  %v631_v7 = vld [vmem:[#allocation5 + $0x40] sm:$0xff]  ;;  %v638_v8 = vld [vmem:[#allocation5 + $0x78] sm:$0xff] }
  0x11   :  { %259 = vmatpush.bf16.msra.mxu3 %v632_v5  ;;  %v630_v9 = vld [vmem:[#allocation5 + $0x38] sm:$0xff]  ;;  %v637_v10 = vld [vmem:[#allocation5 + $0x70] sm:$0xff]  ;;  %v636_v12 = vld [vmem:[#allocation5 + $0x68] sm:$0xff] }
  0x12   :  { %489 = vmatmul.msk.bf16.vlgmr.msra.gmra.mxu0 %vm75_vm0, %v62_v3  ;;  %494 = vmatmul.msk.bf16.vlgmr.msra.gmra.mxu1 %vm75_vm0, %v62_v3  ;;  %v629_v11 = vld [vmem:[#allocation5 + $0x30] sm:$0xff]  ;;  %v628_v13 = vld [vmem:[#allocation5 + $0x28] sm:$0xff]  ;;  %v635_v14 = vld [vmem:[#allocation5 + $0x60] sm:$0xff]  ;;  %v440_v3 = vlaneseq }
  0x13   :  { %v627_v15 = vld [vmem:[#allocation5 + $0x20] sm:$0xff]  ;;  %v634_v16 = vld [vmem:[#allocation5 + $0x58] sm:$0xff]  ;;  %v633_v18 = vld [vmem:[#allocation5 + $0x50] sm:$0xff] }
  0x14   :  { %199 = vmatpush.bf16.msra.mxu2 %v639_v6  ;;  %v626_v17 = vld [vmem:[#allocation5 + $0x18] sm:$0xff]  ;;  %v625_v19 = vld [vmem:[#allocation5 + $0x10] sm:$0xff]  ;;  %v648_v20 = vld [vmem:[#allocation5 + $0xc8] sm:$0xff]  ;;  %v441_v4 = vand.u32 127, %v440_v3 }
  0x15   :  { %260 = vmatpush.bf16.msra.mxu3 %v631_v7  ;;  %341 = vmatpush.bf16.msrb.mxu0 %v648_v20  ;;  %v647_v21 = vld [vmem:[#allocation5 + $0xc0] sm:$0xff]  ;;  %v646_v22 = vld [vmem:[#allocation5 + $0xb8] sm:$0xff]  ;;  %v645_v23 = vld [vmem:[#allocation5 + $0xb0] sm:$0xff] }
  0x16   :  { %v644_v24 = vld [vmem:[#allocation5 + $0xa8] sm:$0xff]  ;;  %v67_v25 = vld [vmem:[#allocation7] ss:$0 sm:$0xff]  ;;  %v68_v26 = vld [vmem:[#allocation7 + $0x8] ss:$0 sm:$0xff]  ;;  %vm443_vm1 = vcmp.ge.s32.totalorder %v441_v4, 4 }
  0x17   :  { %v643_v39 = vld [vmem:[#allocation5 + $0xa0] sm:$0xff]  ;;  %v642_v40 = vld [vmem:[#allocation5 + $0x98] sm:$0xff]  ;;  %v641_v41 = vld [vmem:[#allocation5 + $0x90] sm:$0xff]  ;;  %vm445_vm2 = vcmp.lt.s32.totalorder %v441_v4, 8 }
  0x18   :  { %200 = vmatpush.bf16.msra.mxu2 %v638_v8  ;;  %v656_v42 = vld [vmem:[#allocation5 + $0x108] sm:$0xff]  ;;  %v655_v43 = vld [vmem:[#allocation5 + $0x100] sm:$0xff]  ;;  %v654_v44 = vld [vmem:[#allocation5 + $0xf8] sm:$0xff] }
  0x19   :  { %261 = vmatpush.bf16.msra.mxu3 %v630_v9  ;;  %342 = vmatpush.bf16.msrb.mxu0 %v647_v21  ;;  %v653_v45 = vld [vmem:[#allocation5 + $0xf0] sm:$0xff]  ;;  %v652_v46 = vld [vmem:[#allocation5 + $0xe8] sm:$0xff]  ;;  %v651_v47 = vld [vmem:[#allocation5 + $0xe0] sm:$0xff] }
  0x1a   :  { %422 = vmatpush.bf16.msrb.mxu1 %v656_v42  ;;  %v149_v49 = vld [vmem:[#allocation7 + $0x1] ss:$0 sm:$0xff]  ;;  %v650_v58 = vld [vmem:[#allocation5 + $0xd8] sm:$0xff]  ;;  %v292_v60 = vld [vmem:[#allocation7 + $0x2] ss:$0 sm:$0xff] }
  0x1b   :  { %v649_v59 = vld [vmem:[#allocation5 + $0xd0] sm:$0xff]  ;;  %vm446_vm3 = vmand %vm443_vm1, %vm445_vm2 }
  0x1c   :  { %201 = vmatpush.bf16.msra.mxu2 %v637_v10  ;;  %v373_v5 = vld [vmem:[#allocation7 + $0x3] ss:$0 sm:$0xff] }
  0x1d   :  { %262 = vmatpush.bf16.msra.mxu3 %v629_v11  ;;  %343 = vmatpush.bf16.msrb.mxu0 %v646_v22 }
  0x1e   :  { %423 = vmatpush.bf16.msrb.mxu1 %v655_v43 }
  0x20   :  { %202 = vmatpush.bf16.msra.mxu2 %v636_v12 }
  0x21   :  { %263 = vmatpush.bf16.msra.mxu3 %v628_v13  ;;  %344 = vmatpush.bf16.msrb.mxu0 %v645_v23 }
  0x22   :  { %424 = vmatpush.bf16.msrb.mxu1 %v654_v44 }
  0x24   :  { %203 = vmatpush.bf16.msra.mxu2 %v635_v14 }
  0x25   :  { %264 = vmatpush.bf16.msra.mxu3 %v627_v15  ;;  %345 = vmatpush.bf16.msrb.mxu0 %v644_v24 }
  0x26   :  { %425 = vmatpush.bf16.msrb.mxu1 %v653_v45 }
  0x28   :  { %204 = vmatpush.bf16.msra.mxu2 %v634_v16 }
  0x29   :  { %265 = vmatpush.bf16.msra.mxu3 %v626_v17  ;;  %346 = vmatpush.bf16.msrb.mxu0 %v643_v39 }
  0x2a   :  { %426 = vmatpush.bf16.msrb.mxu1 %v652_v46 }
  0x2c   :  { %205 = vmatpush.bf16.msra.mxu2 %v633_v18 }
  0x2d   :  { %266 = vmatpush.bf16.msra.mxu3 %v625_v19  ;;  %347 = vmatpush.bf16.msrb.mxu0 %v642_v40 }
  0x2e   :  { %427 = vmatpush.bf16.msrb.mxu1 %v651_v47 }
  0x31   :  { %348 = vmatpush.bf16.msrb.mxu0 %v641_v41 }
  0x32   :  { %428 = vmatpush.bf16.msrb.mxu1 %v650_v58 }
  0x36   :  { %429 = vmatpush.bf16.msrb.mxu1 %v649_v59 }
  0x8f   :  { %v88_v27 = vpop.f32.mrf.mxu0  ;;  %v110_v28 = vpop.f32.mrf.mxu1 }
  0x90   :  { %v89_v29 = vadd.f32 %v88_v27, %v67_v25  ;;  %v111_v30 = vadd.f32 %v110_v28, %v68_v26 }
  0x92   :  { %v92_v31 = vmul.f32 0.01, %v89_v29  ;;  %v114_v32 = vmul.f32 0.01, %v111_v30 }
  0x94   :  { %v115_v33 = vmax.f32 %v111_v30, %v114_v32  ;;  %v93_v34 = vmax.f32 %v89_v29, %v92_v31 }
  0x96   :  { %v116_v35 = vpack.c.bf16 %v115_v33, %v115_v33  ;;  %v94_v36 = vpack.c.bf16 %v93_v34, %v93_v34 }
  0x97   :  { %v90_v37 = vpop.f32.mrf.mxu0  ;;  %v112_v38 = vpop.f32.mrf.mxu1 }
  0x98   :  { %206 = vmatmul.bf16.vlgmr.msra.gmra.mxu2 %v116_v35  ;;  %267 = vmatmul.bf16.vlgmr.msra.gmra.mxu3 %v94_v36 }
 0x11b   :  { %v207_v48 = vpop.f32.mrf.mxu2  ;;  %v268_v50 = vpop.f32.mrf.mxu3 }
 0x11c   :  { %v269_v51 = vadd.f32 %v268_v50, %v207_v48 }
 0x11e   :  { %v272_v52 = vadd.f32 %v269_v51, %v149_v49 }
 0x120   :  { %v273_v53 = vmul.f32 0.01, %v272_v52 }
 0x122   :  { %v274_v54 = vmax.f32 %v272_v52, %v273_v53 }
 0x123   :  { %v209_v55 = vpop.f32.mrf.mxu2  ;;  %v270_v56 = vpop.f32.mrf.mxu3 }
 0x124   :  { %v275_v57 = vpack.c.bf16 %v274_v54, %v274_v54 }
 0x126   :  { %349 = vmatmul.bf16.vlgmr.msrb.gmra.mxu0 %v275_v57 }
 0x1a3   :  { %v350_v61 = vpop.f32.mrf.mxu0 }
 0x1a4   :  { %v351_v62 = vadd.f32 %v350_v61, %v292_v60 }
 0x1a6   :  { %v354_v63 = vmul.f32 0.01, %v351_v62 }
 0x1a8   :  { %v355_v0 = vmax.f32 %v351_v62, %v354_v63 }
 0x1aa   :  { %v356_v1 = vpack.c.bf16 %v355_v0, %v355_v0 }
 0x1ab   :  { %v352_v2 = vpop.f32.mrf.mxu0 }
 0x1ac   :  { %430 = vmatmul.bf16.vlgmr.msrb.gmra.mxu1 %v356_v1 }
 0x229   :  { %v431_v6 = vpop.f32.mrf.mxu1 }
 0x22a   :  { %v432_v7 = vadd.f32 %v431_v6, %v373_v5 }
 0x22c   :  { %v447_v8 = vsel %vm446_vm3, %v432_v7, 0.0 }
 0x22d   :  { %448 = vadd.xlane.f32.xlu0 %v447_v8 }
 0x231   :  { %v433_v9 = vpop.f32.mrf.mxu1 }
 0x2a0   :  { %v449_v10 = vpop.xlane.xlu0 %448 }
 0x2a1   :  { %v450_v11 = vrot.slane %v449_v10, 4 }
 0x2a3   :  { %v451_v12 = vadd.f32 %v450_v11, %v449_v10 }
 0x2a5   :  { %v452_v13 = vrot.slane %v451_v12, 2 }
 0x2a7   :  { %v453_v14 = vadd.f32 %v452_v13, %v451_v12 }
 0x2a9   :  { %v454_v15 = vrot.slane %v453_v14, 1 }
 0x2ab   :  { %v455_v16 = vadd.f32 %v454_v15, %v453_v14 }
 0x2ad   :  { %657 = vpush %v455_v16 }
 0x2de   :  { %s658_s8 = spop %657 }
 0x2df   :  { %v457_v17 = vstv %s658_s8  ;;  %s459_s9 = smul.f32 0.03125, %s658_s8 }
 0x2e0   :  { %458 = vst [vmem:[#allocation8] sm:$0xff] %v457_v17 }
 0x2e1   :  { %v460_v18 = vstv %s459_s9  ;;  %475 = dma.vmem_to_hbm [thread:$0]  %s471_s2, 128, %s473_s7, [#allocation4]  }
 0x2e2   :  { %v461_v19 = vsub.f32 %v432_v7, %v460_v18 }
 0x2e4   :  { %462 = vst [vmem:[%s816_s3] sm:$0xff] %v461_v19 }
 0x2e5   :  { %765 = dma.done.wait [#allocation4], 128  }
 0x2e6   :  { %766 = vsyncadd [#allocation4], 4294967168 }
 0x2e7   :  { %482 = vsyncpa [#allocation3], 1 }
 0x2e8   :  { %483 = vsyncpa [#allocation6], 1 }
 0x2e9   :  { %484 = vsyncpa [#allocation4], 1 }

</bundles_post_ra>
